<compile_context>
chip_gen: v5e
topology: v5e:2x2
jax: 0.10.0
libtpu: 0.0.40
codegen_flags: <defaults>
</compile_context>

<pallas_src>
import functools

import jax
import jax.numpy as jnp
from jax.experimental import pallas as pl
from jax.experimental.pallas import tpu as pltpu


def _round_up(x, m):
    return ((x + m - 1) // m) * m


def _chip_profile():
    """Generation-aware tiling / VMEM budgets (conservative if unknown)."""
    kind = ""
    try:
        kind = jax.devices()[0].device_kind.lower()
    except Exception:  # never fatal
        pass
    # Single-TensorCore, 128-MiB-VMEM chips: bigger tiles, no split axis.
    if any(tag in kind for tag in ("v5 lite", "v5e", "v5litepod", "v6 lite", "v6e")):
        return {"num_splits": 1, "tile_budget": 40 << 20, "vmem_limit": 96 << 20}
    # v7x (64 MiB VMEM, 2 TCs) or unknown: conservative budget, 2-way split.
    return {"num_splits": 2, "tile_budget": 20 << 20, "vmem_limit": 48 << 20}


def _choose_tile_n(n, c, kp, num_splits, tile_budget):
    """Lane-dense tile size (multiple of 128) chosen by VMEM bytes, not a lane cap.

    Per point (lane column) resident at peak:
      2*C  f32  x tile (double-buffered input)
      ~4*Kp f32 per-tile intermediates (cx / d / iota / onehot)
      2    i32  labels tile (double-buffered output on the final pass)
    """
    per_col = 4 * (2 * c + 4 * kp + 2)
    cap = max(128, (tile_budget // per_col) // 128 * 128)
    need = max(128, _round_up(pl.cdiv(n, num_splits), 128))
    return min(cap, need)


def _kmeans_assign_kernel(x_ref, c_ref, csq_ref, *out_refs, n_valid, tile_n,
                          steps_per_split, emit_labels, emit_stats,
                          mask_needed):
    """One grid step processes a lane-dense tile of points.

    x_ref:      (C, TN)   tile of points, feature-major (N on the 128-lane axis)
    c_ref:      (Kp, C)   padded centers (same block every step)
    csq_ref:    (Kp, 1)   precomputed ||c||^2 (+1e30 for padded centers)
    outputs (static selection):
      labels_ref: (1, TN)  int32 assignment per point (lane-dense store)
      sums_ref:   (Kp, C)  per-split accumulated cluster sums   (resident)
      counts_ref: (Kp, 1)  per-split accumulated cluster counts (resident)
    """
    if emit_labels and emit_stats:
        labels_ref, sums_ref, counts_ref = out_refs
    elif emit_labels:
        (labels_ref,) = out_refs
        sums_ref = counts_ref = None
    else:
        labels_ref = None
        sums_ref, counts_ref = out_refs

    split = pl.program_id(0)
    step = pl.program_id(1)

    if emit_stats:
        @pl.when(step == 0)
        def _():
            sums_ref[...] = jnp.zeros_like(sums_ref)
            counts_ref[...] = jnp.zeros_like(counts_ref)

    x = x_ref[...]                      # (C, TN)  f32
    c = c_ref[...]                      # (Kp, C)  f32
    c_sq = csq_ref[...]                 # (Kp, 1)  f32
    kp = c.shape[0]

    # Squared distance up to the per-point constant ||x||^2 (doesn't affect
    # the argmin):  d[k, n] = ||c_k||^2 - 2 * c_k . x_n   (f32 to match torch).
    cx = jax.lax.dot_general(
        c, x, (((1,), (0,)), ((), ())),
        preferred_element_type=jnp.float32)                              # (Kp, TN)
    d = c_sq - 2.0 * cx                                                  # (Kp, TN)

    # argmin over K (sublane axis) with first-match tie-breaking, as torch.argmin.
    iota_k = jax.lax.broadcasted_iota(jnp.int32, d.shape, 0)             # (Kp, TN)
    d_min = jnp.min(d, axis=0, keepdims=True)                            # (1, TN)
    labels = jnp.min(jnp.where(d == d_min, iota_k, kp), axis=0,
                     keepdims=True).astype(jnp.int32)                    # (1, TN)

    if emit_labels:
        labels_ref[...] = labels

    if emit_stats:
        # scatter_add via one-hot matmul on the MXU (contraction depth = TN).
        # f32 operands so cluster sums keep the reference's precision.
        onehot = (labels == iota_k).astype(jnp.float32)                  # (Kp, TN)

        def accumulate(oh):
            sums_ref[...] += jax.lax.dot_general(
                oh, x, (((1,), (1,)), ((), ())),
                preferred_element_type=jnp.float32)                      # (Kp, C)
            # f32 counts match the reference (float32 scatter_add of ones);
            # exact up to 2^24 points per cluster.
            counts_ref[...] += jnp.sum(oh, axis=1, keepdims=True)        # (Kp, 1)

        if mask_needed:
            # Only tiles touching the N-padding region pay for the mask.
            base = (split * steps_per_split + step) * tile_n
            has_pad = base + tile_n > n_valid

            @pl.when(has_pad)
            def _():
                gidx = base + jax.lax.broadcasted_iota(
                    jnp.int32, (1, tile_n), 1)
                valid = (gidx < n_valid).astype(jnp.float32)             # (1, TN)
                accumulate(onehot * valid)

            @pl.when(jnp.logical_not(has_pad))
            def _():
                accumulate(onehot)
        else:
            accumulate(onehot)


def kmeans_assign_padded(x_t_pad, centers, *, n_valid, tile_n, num_splits,
                         steps, vmem_limit, emit_labels, emit_stats):
    """Pallas call on pre-padded feature-major points.

    x_t_pad: (C, N_pad) f32, N_pad == num_splits * steps * tile_n
    centers: (K, C) f32
    Returns (labels (n_valid,) or None, sums (K, C) or None, counts (K,) or None).
    """
    C, n_pad = x_t_pad.shape
    K = centers.shape[0]
    Kp = max(8, _round_up(K, 8))

    # Pad centers on the sublane axis; hoist ||c||^2 out of the kernel body.
    c_pad = jnp.zeros((Kp, C), jnp.float32).at[:K, :].set(
        centers.astype(jnp.float32))
    c_sq = jnp.sum(c_pad * c_pad, axis=1, keepdims=True)
    if Kp > K:
        c_sq = c_sq.at[K:, :].set(1e30)  # padded centers never win the argmin

    mask_needed = bool(n_pad != n_valid) and emit_stats

    kernel = functools.partial(
        _kmeans_assign_kernel, n_valid=n_valid, tile_n=tile_n,
        steps_per_split=steps, emit_labels=emit_labels,
        emit_stats=emit_stats, mask_needed=mask_needed)

    out_shape = []
    out_specs = []
    if emit_labels:
        out_shape.append(jax.ShapeDtypeStruct((1, n_pad), jnp.int32))
        out_specs.append(
            pl.BlockSpec((1, tile_n), lambda s, i: (0, s * steps + i)))
    if emit_stats:
        out_shape.append(jax.ShapeDtypeStruct((num_splits, Kp, C), jnp.float32))
        out_specs.append(pl.BlockSpec((None, Kp, C), lambda s, i: (s, 0, 0)))
        out_shape.append(jax.ShapeDtypeStruct((num_splits, Kp, 1), jnp.float32))
        out_specs.append(pl.BlockSpec((None, Kp, 1), lambda s, i: (s, 0, 0)))

    # The step axis is a reduction only when accumulating stats.
    step_sem = "arbitrary" if emit_stats else "parallel"

    outs = pl.pallas_call(
        kernel,
        out_shape=tuple(out_shape),
        grid=(num_splits, steps),
        in_specs=[
            pl.BlockSpec((C, tile_n), lambda s, i: (0, s * steps + i)),
            pl.BlockSpec((Kp, C), lambda s, i: (0, 0)),
            pl.BlockSpec((Kp, 1), lambda s, i: (0, 0)),
        ],
        out_specs=tuple(out_specs),
        compiler_params=pltpu.CompilerParams(
            # leading split axis parallel (2 TCs on v7x); serial elsewhere.
            dimension_semantics=("parallel", step_sem),
            vmem_limit_bytes=vmem_limit,
        ),
    )(x_t_pad, c_pad, c_sq)

    idx = 0
    labels = sums = counts = None
    if emit_labels:
        labels = outs[idx][0, :n_valid]
        idx += 1
    if emit_stats:
        sums = jnp.sum(outs[idx], axis=0)[:K, :]
        counts = jnp.sum(outs[idx + 1], axis=0)[:K, 0]
    return labels, sums, counts


@functools.partial(
    jax.jit,
    static_argnames=("K", "max_iters", "n_valid", "tile_n", "num_splits",
                     "steps", "vmem_limit"))
def _kmeans_forward_impl(x_t_pad, key, ema_decay, tol, eps, *, K, max_iters,
                         n_valid, tile_n, num_splits, steps, vmem_limit):
    # torch.randperm(N)[:K] -> jax permutation (deterministic in-script).
    perm = jax.random.permutation(key, n_valid)[:K]
    ema0 = x_t_pad[:, perm].T.astype(jnp.float32)          # (K, C)

    assign = functools.partial(
        kmeans_assign_padded, x_t_pad, n_valid=n_valid, tile_n=tile_n,
        num_splits=num_splits, steps=steps, vmem_limit=vmem_limit)

    def body(carry):
        ema, _, i, _ = carry
        # In-loop assigns are labels-free: only sums/counts leave the kernel.
        _, sums, counts = assign(ema, emit_labels=False, emit_stats=True)
        centers = sums / (counts[:, None] + eps)
        # Dead-center handling: reference's reinit counter goes to -1 and never
        # hits 0, so only the copy-back branch is live.
        dead = counts == 0
        centers = jnp.where(dead[:, None], ema, centers)
        # update_ema_jit: ema = ema*decay + (1-decay)*centers
        ema_new = ema * ema_decay + (1.0 - ema_decay) * centers
        err = jnp.linalg.norm(ema_new - centers)
        return ema_new, ema, i + 1, err < tol

    def cond(carry):
        _, _, i, conv = carry
        return jnp.logical_and(i < max_iters, jnp.logical_not(conv))

    init = (ema0, ema0, jnp.int32(0), jnp.array(False))
    ema_f, ema_prev, _, conv_f = jax.lax.while_loop(cond, body, init)

    # Reference semantics: on early convergence, labels come from the
    # pre-EMA-update centers of the converged iteration (ema_prev); if the
    # loop never broke, labels are recomputed with the final EMA centers.
    label_centers = jnp.where(conv_f, ema_prev, ema_f)
    labels, _, _ = assign(label_centers, emit_labels=True, emit_stats=False)
    return labels, ema_f


class KMeansPallas:
    """JAX/Pallas port of the PyTorch KMeans module (training-mode forward)."""

    def __init__(self, params):
        self.K = params["num_centers"]
        self.ema_decay = params["ema_decay"]
        self.tol = params["tol"]
        self.eps = params["eps"]
        self.max_iters = params["max_iters"]
        self.ema_centers = None
        self.training = True

    def forward(self, x, key):
        b, c, t = x.shape
        n = b * t
        # Feature-major (C, N): the big N axis lives on the 128-lane dim.
        x_t = jnp.transpose(x, (1, 0, 2)).reshape(c, n).astype(jnp.float32)

        prof = _chip_profile()
        num_splits = prof["num_splits"]
        kp = max(8, _round_up(self.K, 8))
        tile_n = _choose_tile_n(n, c, kp, num_splits, prof["tile_budget"])
        chunk = num_splits * tile_n
        n_pad = _round_up(n, chunk)
        steps = n_pad // chunk
        if n_pad != n:
            x_t = jnp.pad(x_t, ((0, 0), (0, n_pad - n)))

        # TODO(synk): eval-mode path (reuse previously stored ema_centers
        # without re-initialization) is not exercised in this script.
        labels, ema = _kmeans_forward_impl(
            x_t, key, self.ema_decay, self.tol, self.eps,
            K=self.K, max_iters=self.max_iters, n_valid=n,
            tile_n=tile_n, num_splits=num_splits, steps=steps,
            vmem_limit=prof["vmem_limit"])
        self.ema_centers = ema
        # TODO(synk): if the whole padded point matrix fits in VMEM, a
        # fully VMEM-resident in-kernel Lloyd loop would remove the per-
        # iteration HBM re-stream of x; not implemented here.
        # TODO(synk): reference `print(self.ema_centers)` omitted so stdout is
        # limited to "KERNEL_OK".
        return labels


if __name__ == "__main__":
    params = {
        "num_centers": 4,
        "ema_decay": 0.99,
        "tol": 1e-4,
        "eps": 1e-6,
        "max_iters": 5,
    }
    key = jax.random.PRNGKey(0)
    k_x, k_perm = jax.random.split(key)

    # Small shapes consistent with forward(x: (b, c, t)).
    b, c, t = 2, 8, 16
    x = jax.random.normal(k_x, (b, c, t), dtype=jnp.float32)

    model = KMeansPallas(params)
    labels = jax.block_until_ready(model.forward(x, k_perm))

    assert labels.shape == (b * t,)
    assert labels.dtype == jnp.int32
    assert bool(jnp.all((labels >= 0) & (labels < params["num_centers"])))
    print("KERNEL_OK")
</pallas_src>

<mosaic_0001>
module attributes {stable_mosaic.version = 11 : i64} {
  func.func @_kmeans_assign_kernel(%arg0: i32, %arg1: i32, %arg2: memref<8x128xf32, #tpu.memory_space<vmem>>, %arg3: memref<8x8xf32, #tpu.memory_space<vmem>>, %arg4: memref<8x1xf32, #tpu.memory_space<vmem>>, %arg5: memref<1x8x8xf32, #tpu.memory_space<vmem>>, %arg6: memref<1x8x1xf32, #tpu.memory_space<vmem>>) attributes {dimension_semantics = [#tpu.dimension_semantics<parallel>, #tpu.dimension_semantics<arbitrary>], iteration_bounds = array<i64: 2, 1>, scalar_prefetch = 0 : i64, scratch_operands = 0 : i64, tpu.core_type = #tpu.core_type<tc>, window_params = [{transform_indices = @transform_0, window_bounds = array<i64: 8, 128>}, {pipeline_mode = #tpu.pipeline_mode<synchronous>, transform_indices = @transform_1, window_bounds = array<i64: 8, 8>}, {pipeline_mode = #tpu.pipeline_mode<synchronous>, transform_indices = @transform_2, window_bounds = array<i64: 8, 1>}, {transform_indices = @transform_3, window_bounds = array<i64: 1, 8, 8>}, {transform_indices = @transform_4, window_bounds = array<i64: 1, 8, 1>}]} {
    %c0_i32 = arith.constant 0 : i32
    %0 = arith.cmpi eq, %arg1, %c0_i32 : i32
    %1 = arith.extui %0 : i1 to i32
    %c0_i32_0 = arith.constant 0 : i32
    %2 = arith.cmpi ne, %1, %c0_i32_0 : i32
    scf.if %2 {
      %cst_12 = arith.constant 0.000000e+00 : f32
      %34 = vector.broadcast %cst_12 : f32 to vector<8x8xf32>
      %c0_13 = arith.constant 0 : index
      %c0_14 = arith.constant 0 : index
      %c0_15 = arith.constant 0 : index
      %35 = vector.load %arg5[%c0_13, %c0_14, %c0_15] : memref<1x8x8xf32, #tpu.memory_space<vmem>>, vector<1x8x8xf32>
      %36 = vector.shape_cast %35 : vector<1x8x8xf32> to vector<8x8xf32>
      %37 = vector.shape_cast %34 : vector<8x8xf32> to vector<1x8x8xf32>
      tpu.vector_store %arg5[%c0_13, %c0_14, %c0_15], %37 {strides = array<i32>} : memref<1x8x8xf32, #tpu.memory_space<vmem>>, vector<1x8x8xf32>,
      %cst_16 = arith.constant 0.000000e+00 : f32
      %38 = vector.broadcast %cst_16 : f32 to vector<8x1xf32>
      %c0_17 = arith.constant 0 : index
      %c0_18 = arith.constant 0 : index
      %c0_19 = arith.constant 0 : index
      %39 = vector.load %arg6[%c0_17, %c0_18, %c0_19] : memref<1x8x1xf32, #tpu.memory_space<vmem>>, vector<1x8x1xf32>
      %40 = vector.shape_cast %39 : vector<1x8x1xf32> to vector<8x1xf32>
      %41 = vector.shape_cast %38 : vector<8x1xf32> to vector<1x8x1xf32>
      tpu.vector_store %arg6[%c0_17, %c0_18, %c0_19], %41 {strides = array<i32>} : memref<1x8x1xf32, #tpu.memory_space<vmem>>, vector<1x8x1xf32>,
    } else {
    }
    %c0 = arith.constant 0 : index
    %c0_1 = arith.constant 0 : index
    %3 = vector.load %arg2[%c0, %c0_1] : memref<8x128xf32, #tpu.memory_space<vmem>>, vector<8x128xf32>
    %c0_2 = arith.constant 0 : index
    %c0_3 = arith.constant 0 : index
    %4 = vector.load %arg3[%c0_2, %c0_3] : memref<8x8xf32, #tpu.memory_space<vmem>>, vector<8x8xf32>
    %c0_4 = arith.constant 0 : index
    %c0_5 = arith.constant 0 : index
    %5 = vector.load %arg4[%c0_4, %c0_5] : memref<8x1xf32, #tpu.memory_space<vmem>>, vector<8x1xf32>
    %cst = arith.constant dense<0.000000e+00> : vector<8x128xf32>
    %6 = tpu.matmul %4, %3, %cst {dimension_numbers = #tpu.dot_dimension_numbers<[1], [0], [0], [1], [0, 0, 1, 1], [], []>} : vector<8x8xf32>, vector<8x128xf32>, vector<8x128xf32> -> vector<8x128xf32>
    %cst_6 = arith.constant 2.000000e+00 : f32
    %7 = vector.broadcast %cst_6 : f32 to vector<8x128xf32>
    %8 = arith.mulf %7, %6 : vector<8x128xf32>
    %9 = vector.broadcast %5 : vector<8x1xf32> to vector<8x128xf32>
    %10 = arith.subf %9, %8 : vector<8x128xf32>
    %11 = tpu.iota {dimensions = array<i32: 0>} : vector<8x128xi32>
    %cst_7 = arith.constant dense<0x7F800000> : vector<128xf32>
    %12 = vector.multi_reduction <minimumf>, %10, %cst_7 [0] : vector<8x128xf32> to vector<128xf32>
    %13 = vector.shape_cast %12 : vector<128xf32> to vector<1x128xf32>
    %14 = vector.broadcast %13 : vector<1x128xf32> to vector<8x128xf32>
    %15 = arith.cmpf oeq, %10, %14 : vector<8x128xf32>
    %c8_i32 = arith.constant 8 : i32
    %16 = vector.broadcast %c8_i32 : i32 to vector<8x128xi32>
    %17 = arith.select %15, %11, %16 : vector<8x128xi1>, vector<8x128xi32>
    %cst_8 = arith.constant dense<2147483647> : vector<128xi32>
    %18 = vector.multi_reduction <minsi>, %17, %cst_8 [0] : vector<8x128xi32> to vector<128xi32>
    %19 = vector.shape_cast %18 : vector<128xi32> to vector<1x128xi32>
    %20 = vector.broadcast %19 : vector<1x128xi32> to vector<8x128xi32>
    %21 = arith.cmpi eq, %20, %11 : vector<8x128xi32>
    %22 = arith.extui %21 : vector<8x128xi1> to vector<8x128xi32>
    %23 = arith.sitofp %22 : vector<8x128xi32> to vector<8x128xf32>
    %c1_i32 = arith.constant 1 : i32
    %24 = arith.muli %arg0, %c1_i32 : i32
    %25 = arith.addi %24, %arg1 : i32
    %c128_i32 = arith.constant 128 : i32
    %26 = arith.muli %25, %c128_i32 : i32
    %c128_i32_9 = arith.constant 128 : i32
    %27 = arith.addi %26, %c128_i32_9 : i32
    %c32_i32 = arith.constant 32 : i32
    %28 = arith.cmpi sgt, %27, %c32_i32 : i32
    %29 = arith.extui %28 : i1 to i32
    %c0_i32_10 = arith.constant 0 : i32
    %30 = arith.cmpi ne, %29, %c0_i32_10 : i32
    scf.if %30 {
      %34 = tpu.iota {dimensions = array<i32: 1>} : vector<1x128xi32>
      %35 = vector.broadcast %26 : i32 to vector<1x128xi32>
      %36 = arith.addi %35, %34 : vector<1x128xi32>
      %c32_i32_12 = arith.constant 32 : i32
      %37 = vector.broadcast %c32_i32_12 : i32 to vector<1x128xi32>
      %38 = arith.cmpi slt, %36, %37 : vector<1x128xi32>
      %39 = arith.extui %38 : vector<1x128xi1> to vector<1x128xi32>
      %40 = arith.sitofp %39 : vector<1x128xi32> to vector<1x128xf32>
      %41 = vector.broadcast %40 : vector<1x128xf32> to vector<8x128xf32>
      %42 = arith.mulf %23, %41 : vector<8x128xf32>
      %c0_13 = arith.constant 0 : index
      %c0_14 = arith.constant 0 : index
      %c0_15 = arith.constant 0 : index
      %43 = vector.load %arg5[%c0_13, %c0_14, %c0_15] : memref<1x8x8xf32, #tpu.memory_space<vmem>>, vector<1x8x8xf32>
      %44 = vector.shape_cast %43 : vector<1x8x8xf32> to vector<8x8xf32>
      %cst_16 = arith.constant dense<0.000000e+00> : vector<8x8xf32>
      %45 = tpu.matmul %42, %3, %cst_16 {dimension_numbers = #tpu.dot_dimension_numbers<[1], [1], [0], [0], [0, 0, 1, 0], [], []>} : vector<8x128xf32>, vector<8x128xf32>, vector<8x8xf32> -> vector<8x8xf32>
      %46 = arith.addf %44, %45 : vector<8x8xf32>
      %c0_17 = arith.constant 0 : index
      %c0_18 = arith.constant 0 : index
      %c0_19 = arith.constant 0 : index
      %47 = vector.load %arg5[%c0_17, %c0_18, %c0_19] : memref<1x8x8xf32, #tpu.memory_space<vmem>>, vector<1x8x8xf32>
      %48 = vector.shape_cast %47 : vector<1x8x8xf32> to vector<8x8xf32>
      %49 = vector.shape_cast %46 : vector<8x8xf32> to vector<1x8x8xf32>
      tpu.vector_store %arg5[%c0_17, %c0_18, %c0_19], %49 {strides = array<i32>} : memref<1x8x8xf32, #tpu.memory_space<vmem>>, vector<1x8x8xf32>,
      %c0_20 = arith.constant 0 : index
      %c0_21 = arith.constant 0 : index
      %c0_22 = arith.constant 0 : index
      %50 = vector.load %arg6[%c0_20, %c0_21, %c0_22] : memref<1x8x1xf32, #tpu.memory_space<vmem>>, vector<1x8x1xf32>
      %51 = vector.shape_cast %50 : vector<1x8x1xf32> to vector<8x1xf32>
      %cst_23 = arith.constant dense<0.000000e+00> : vector<8xf32>
      %52 = vector.multi_reduction <add>, %42, %cst_23 [1] : vector<8x128xf32> to vector<8xf32>
      %53 = vector.shape_cast %52 : vector<8xf32> to vector<8x1xf32>
      %54 = arith.addf %51, %53 : vector<8x1xf32>
      %c0_24 = arith.constant 0 : index
      %c0_25 = arith.constant 0 : index
      %c0_26 = arith.constant 0 : index
      %55 = vector.load %arg6[%c0_24, %c0_25, %c0_26] : memref<1x8x1xf32, #tpu.memory_space<vmem>>, vector<1x8x1xf32>
      %56 = vector.shape_cast %55 : vector<1x8x1xf32> to vector<8x1xf32>
      %57 = vector.shape_cast %54 : vector<8x1xf32> to vector<1x8x1xf32>
      tpu.vector_store %arg6[%c0_24, %c0_25, %c0_26], %57 {strides = array<i32>} : memref<1x8x1xf32, #tpu.memory_space<vmem>>, vector<1x8x1xf32>,
    } else {
    }
    %true = arith.constant true
    %31 = arith.xori %28, %true : i1
    %32 = arith.extui %31 : i1 to i32
    %c0_i32_11 = arith.constant 0 : i32
    %33 = arith.cmpi ne, %32, %c0_i32_11 : i32
    scf.if %33 {
      %c0_12 = arith.constant 0 : index
      %c0_13 = arith.constant 0 : index
      %c0_14 = arith.constant 0 : index
      %34 = vector.load %arg5[%c0_12, %c0_13, %c0_14] : memref<1x8x8xf32, #tpu.memory_space<vmem>>, vector<1x8x8xf32>
      %35 = vector.shape_cast %34 : vector<1x8x8xf32> to vector<8x8xf32>
      %cst_15 = arith.constant dense<0.000000e+00> : vector<8x8xf32>
      %36 = tpu.matmul %23, %3, %cst_15 {dimension_numbers = #tpu.dot_dimension_numbers<[1], [1], [0], [0], [0, 0, 1, 0], [], []>} : vector<8x128xf32>, vector<8x128xf32>, vector<8x8xf32> -> vector<8x8xf32>
      %37 = arith.addf %35, %36 : vector<8x8xf32>
      %c0_16 = arith.constant 0 : index
      %c0_17 = arith.constant 0 : index
      %c0_18 = arith.constant 0 : index
      %38 = vector.load %arg5[%c0_16, %c0_17, %c0_18] : memref<1x8x8xf32, #tpu.memory_space<vmem>>, vector<1x8x8xf32>
      %39 = vector.shape_cast %38 : vector<1x8x8xf32> to vector<8x8xf32>
      %40 = vector.shape_cast %37 : vector<8x8xf32> to vector<1x8x8xf32>
      tpu.vector_store %arg5[%c0_16, %c0_17, %c0_18], %40 {strides = array<i32>} : memref<1x8x8xf32, #tpu.memory_space<vmem>>, vector<1x8x8xf32>,
      %c0_19 = arith.constant 0 : index
      %c0_20 = arith.constant 0 : index
      %c0_21 = arith.constant 0 : index
      %41 = vector.load %arg6[%c0_19, %c0_20, %c0_21] : memref<1x8x1xf32, #tpu.memory_space<vmem>>, vector<1x8x1xf32>
      %42 = vector.shape_cast %41 : vector<1x8x1xf32> to vector<8x1xf32>
      %cst_22 = arith.constant dense<0.000000e+00> : vector<8xf32>
      %43 = vector.multi_reduction <add>, %23, %cst_22 [1] : vector<8x128xf32> to vector<8xf32>
      %44 = vector.shape_cast %43 : vector<8xf32> to vector<8x1xf32>
      %45 = arith.addf %42, %44 : vector<8x1xf32>
      %c0_23 = arith.constant 0 : index
      %c0_24 = arith.constant 0 : index
      %c0_25 = arith.constant 0 : index
      %46 = vector.load %arg6[%c0_23, %c0_24, %c0_25] : memref<1x8x1xf32, #tpu.memory_space<vmem>>, vector<1x8x1xf32>
      %47 = vector.shape_cast %46 : vector<1x8x1xf32> to vector<8x1xf32>
      %48 = vector.shape_cast %45 : vector<8x1xf32> to vector<1x8x1xf32>
      tpu.vector_store %arg6[%c0_23, %c0_24, %c0_25], %48 {strides = array<i32>} : memref<1x8x1xf32, #tpu.memory_space<vmem>>, vector<1x8x1xf32>,
    } else {
    }
    return
  }
  func.func @transform_0(%arg0: i32, %arg1: i32) -> (i32, i32) {
    %c1_i32 = arith.constant 1 : i32
    %0 = arith.muli %arg0, %c1_i32 : i32
    %1 = arith.addi %0, %arg1 : i32
    %c0_i32 = arith.constant 0 : i32
    %c0_i32_0 = arith.constant 0 : i32
    return %c0_i32, %1 : i32, i32
  }
  func.func @transform_1(%arg0: i32, %arg1: i32) -> (i32, i32) {
    %c0_i32 = arith.constant 0 : i32
    %c0_i32_0 = arith.constant 0 : i32
    %c0_i32_1 = arith.constant 0 : i32
    return %c0_i32, %c0_i32_0 : i32, i32
  }
  func.func @transform_2(%arg0: i32, %arg1: i32) -> (i32, i32) {
    %c0_i32 = arith.constant 0 : i32
    %c0_i32_0 = arith.constant 0 : i32
    %c0_i32_1 = arith.constant 0 : i32
    return %c0_i32, %c0_i32_0 : i32, i32
  }
  func.func @transform_3(%arg0: i32, %arg1: i32) -> (i32, i32, i32) {
    %c0_i32 = arith.constant 0 : i32
    %c0_i32_0 = arith.constant 0 : i32
    %c0_i32_1 = arith.constant 0 : i32
    return %arg0, %c0_i32, %c0_i32_0 : i32, i32, i32
  }
  func.func @transform_4(%arg0: i32, %arg1: i32) -> (i32, i32, i32) {
    %c0_i32 = arith.constant 0 : i32
    %c0_i32_0 = arith.constant 0 : i32
    %c0_i32_1 = arith.constant 0 : i32
    return %arg0, %c0_i32, %c0_i32_0 : i32, i32, i32
  }
}

module attributes {stable_mosaic.version = 11 : i64} {
  func.func @_kmeans_assign_kernel(%arg0: i32, %arg1: i32, %arg2: memref<8x128xf32, #tpu.memory_space<vmem>>, %arg3: memref<8x8xf32, #tpu.memory_space<vmem>>, %arg4: memref<8x1xf32, #tpu.memory_space<vmem>>, %arg5: memref<1x128xi32, #tpu.memory_space<vmem>>) attributes {dimension_semantics = [#tpu.dimension_semantics<parallel>, #tpu.dimension_semantics<parallel>], iteration_bounds = array<i64: 2, 1>, scalar_prefetch = 0 : i64, scratch_operands = 0 : i64, tpu.core_type = #tpu.core_type<tc>, window_params = [{transform_indices = @transform_0, window_bounds = array<i64: 8, 128>}, {pipeline_mode = #tpu.pipeline_mode<synchronous>, transform_indices = @transform_1, window_bounds = array<i64: 8, 8>}, {pipeline_mode = #tpu.pipeline_mode<synchronous>, transform_indices = @transform_2, window_bounds = array<i64: 8, 1>}, {transform_indices = @transform_3, window_bounds = array<i64: 1, 128>}]} {
    %c0 = arith.constant 0 : index
    %c0_0 = arith.constant 0 : index
    %0 = vector.load %arg2[%c0, %c0_0] : memref<8x128xf32, #tpu.memory_space<vmem>>, vector<8x128xf32>
    %c0_1 = arith.constant 0 : index
    %c0_2 = arith.constant 0 : index
    %1 = vector.load %arg3[%c0_1, %c0_2] : memref<8x8xf32, #tpu.memory_space<vmem>>, vector<8x8xf32>
    %c0_3 = arith.constant 0 : index
    %c0_4 = arith.constant 0 : index
    %2 = vector.load %arg4[%c0_3, %c0_4] : memref<8x1xf32, #tpu.memory_space<vmem>>, vector<8x1xf32>
    %cst = arith.constant dense<0.000000e+00> : vector<8x128xf32>
    %3 = tpu.matmul %1, %0, %cst {dimension_numbers = #tpu.dot_dimension_numbers<[1], [0], [0], [1], [0, 0, 1, 1], [], []>} : vector<8x8xf32>, vector<8x128xf32>, vector<8x128xf32> -> vector<8x128xf32>
    %cst_5 = arith.constant 2.000000e+00 : f32
    %4 = vector.broadcast %cst_5 : f32 to vector<8x128xf32>
    %5 = arith.mulf %4, %3 : vector<8x128xf32>
    %6 = vector.broadcast %2 : vector<8x1xf32> to vector<8x128xf32>
    %7 = arith.subf %6, %5 : vector<8x128xf32>
    %8 = tpu.iota {dimensions = array<i32: 0>} : vector<8x128xi32>
    %cst_6 = arith.constant dense<0x7F800000> : vector<128xf32>
    %9 = vector.multi_reduction <minimumf>, %7, %cst_6 [0] : vector<8x128xf32> to vector<128xf32>
    %10 = vector.shape_cast %9 : vector<128xf32> to vector<1x128xf32>
    %11 = vector.broadcast %10 : vector<1x128xf32> to vector<8x128xf32>
    %12 = arith.cmpf oeq, %7, %11 : vector<8x128xf32>
    %c8_i32 = arith.constant 8 : i32
    %13 = vector.broadcast %c8_i32 : i32 to vector<8x128xi32>
    %14 = arith.select %12, %8, %13 : vector<8x128xi1>, vector<8x128xi32>
    %cst_7 = arith.constant dense<2147483647> : vector<128xi32>
    %15 = vector.multi_reduction <minsi>, %14, %cst_7 [0] : vector<8x128xi32> to vector<128xi32>
    %16 = vector.shape_cast %15 : vector<128xi32> to vector<1x128xi32>
    %c0_8 = arith.constant 0 : index
    %c0_9 = arith.constant 0 : index
    %17 = vector.load %arg5[%c0_8, %c0_9] : memref<1x128xi32, #tpu.memory_space<vmem>>, vector<1x128xi32>
    tpu.vector_store %arg5[%c0_8, %c0_9], %16 {strides = array<i32>} : memref<1x128xi32, #tpu.memory_space<vmem>>, vector<1x128xi32>,
    return
  }
  func.func @transform_0(%arg0: i32, %arg1: i32) -> (i32, i32) {
    %c1_i32 = arith.constant 1 : i32
    %0 = arith.muli %arg0, %c1_i32 : i32
    %1 = arith.addi %0, %arg1 : i32
    %c0_i32 = arith.constant 0 : i32
    %c0_i32_0 = arith.constant 0 : i32
    return %c0_i32, %1 : i32, i32
  }
  func.func @transform_1(%arg0: i32, %arg1: i32) -> (i32, i32) {
    %c0_i32 = arith.constant 0 : i32
    %c0_i32_0 = arith.constant 0 : i32
    %c0_i32_1 = arith.constant 0 : i32
    return %c0_i32, %c0_i32_0 : i32, i32
  }
  func.func @transform_2(%arg0: i32, %arg1: i32) -> (i32, i32) {
    %c0_i32 = arith.constant 0 : i32
    %c0_i32_0 = arith.constant 0 : i32
    %c0_i32_1 = arith.constant 0 : i32
    return %c0_i32, %c0_i32_0 : i32, i32
  }
  func.func @transform_3(%arg0: i32, %arg1: i32) -> (i32, i32) {
    %c1_i32 = arith.constant 1 : i32
    %0 = arith.muli %arg0, %c1_i32 : i32
    %1 = arith.addi %0, %arg1 : i32
    %c0_i32 = arith.constant 0 : i32
    %c0_i32_0 = arith.constant 0 : i32
    return %c0_i32, %1 : i32, i32
  }
}

</mosaic_0001>

<bundles_post_ra>
// kernel: _kmeans_forward_impl.1
= control target key start
LH: loop header
LB: loop body
LE: loop exit
PB: predicated region body
PF: predicated region fallthrough
CT: control target
= control target key end

     0   :  { %s381_s12 = smov 0   ;;  %s383_s13 = smov 0   ;;  %s424_s0 = inlined_call_operand.vmem [shape: f32[8,256], index: 0, kind: input, shape index: {}]   ;;  %s425_s1 = inlined_call_operand.vmem [shape: f32[8,8], index: 1, kind: input, shape index: {}]   ;;  %s426_s2 = inlined_call_operand.vmem [shape: f32[8,1], index: 2, kind: input, shape index: {}]   ;;  %s427_s3 = inlined_call_operand.vmem [shape: s32[1,256], index: 3, kind: output, shape index: {}]  }
   0x1   :  { %s385_s14 = smov 0  }
   0x2 LB: > { %s25_s15 = sadd.s32 1, %s354_s13  ;;  %p305_p0 = scmp.ge.s32.totalorder %s358_s14, 1  ;;  %s358_s14 = sphi %s385_s14, %s13_s14   ;;  %s354_s13 = sphi %s383_s13, %s429_s13   ;;  %s350_s12 = sphi %s381_s12, %s428_s12  }
   0x3   : > { %p27_p1 = scmp.ge.s32.totalorder %s25_s15, 2  ;;  %p154_p2 = scmp.lt.s32.totalorder %s358_s14, 3 }
   0x5   : > { %s431_s15 = smov (%p27_p1, %s25_s15), 0  ;;  %p155_p3 = pnand %p305_p0, %p154_p2 }
   0x6   : > { %p178_p4 = scmp.lt.s32.totalorder (!%p155_p3), %s350_s12, 1 }
   0x7   : > { %158 = sbr.rel (%p155_p3) target bundleno = 174 (0xae), region = 32 }
   0xc   : > { %v190_v0 = vld [vmem:[%s426_s2] sm:$0xff]  ;;  %v360_v1 = vmov 0   ;;  %s433_s12 = smov (!%p178_p4, %s350_s12), 1  ;;  %vm191_vm0 = vcmask 64512   ;;  %v222_v11 = vlaneseq }
   0xd   : > { %335 = vset.pattern.permute.xlu0 %v360_v1  ;;  %s306_s18 = sshll.u32 %s433_s12, 3  ;;  %v189_v2 = vld [vmem:[%s425_s1] sm:$0xff]  ;;  %s186_s26 = scalar_lea.vmem %s427_s3, %s433_s12 }
   0xe   : > { %218 = vperm.xlu0 %335, %v190_v0   ;;  %s181_s21 = scalar_lea.vmem %s424_s0, %s306_s18  ;;  %v223_v14 = vshrl.u32 %v222_v11, 7 }
   0xf   : > { %v188_v3 = vld [vmem:[%s181_s21] sm:$0xff] }
  0x10   : > { %210 = vmatpush.msra.mxu0 %v188_v3 }
  0x11   : > { %307 = vmatmul.msk.f32.vlgmr.msra.gmra.mxu0 %vm191_vm0, %v189_v2 }
  0x80   : > { %v219_v5 = vpop.permute.xlu0 %218 }
  0x8e   : > { %v212_v4 = vpop.f32.mrf.mxu0 }
  0x8f   : > { %v215_v6 = vmul.f32 2.0, %v212_v4 }
  0x91   : > { %v221_v7 = vsub.f32 %v219_v5, %v215_v6 }
  0x93   : > { %v224_v8 = vrot.slane %v221_v7, 4 }
  0x95   : > { %v225_v9 = vmin.f32 %v221_v7, %v224_v8 }
  0x97   : > { %v226_v10 = vrot.slane %v225_v9, 2 }
  0x99   : > { %v227_v12 = vmin.f32 %v225_v9, %v226_v10 }
  0x9b   : > { %v228_v13 = vrot.slane %v227_v12, 1 }
  0x9d   : > { %v229_v15 = vmin.f32 %v227_v12, %v228_v13 }
  0x9f   : > { %vm230_vm1 = vcmp.eq.f32.partialorder %v221_v7, %v229_v15 }
  0xa0   : > { %v231_v16 = vsel %vm230_vm1, %v223_v14, 8 }
  0xa1   : > { %v232_v17 = vrot.slane %v231_v16, 4 }
  0xa3   : > { %vm233_vm2 = vcmp.lt.s32.totalorder %v231_v16, %v232_v17 }
  0xa4   : > { %v234_v18 = vsel %vm233_vm2, %v231_v16, %v232_v17 }
  0xa5   : > { %v235_v19 = vrot.slane %v234_v18, 2 }
  0xa7   : > { %vm236_vm3 = vcmp.lt.s32.totalorder %v234_v18, %v235_v19 }
  0xa8   : > { %v237_v20 = vsel %vm236_vm3, %v234_v18, %v235_v19 }
  0xa9   : > { %v238_v21 = vrot.slane %v237_v20, 1 }
  0xab   : > { %vm239_vm4 = vcmp.lt.s32.totalorder %v237_v20, %v238_v21 }
  0xac   : > { %v240_v22 = vsel %vm239_vm4, %v237_v20, %v238_v21 }
  0xad   : > { %241 = vst [vmem:[%s186_s26] sm:$0x1] %v240_v22 }
  0xae PF: > { %s13_s14 = sadd.s32 1, %s358_s14   ;;  %s428_s12 = smov %s354_s13 }
  0xaf   : > { %p10_p5 = scmp.ge.s32.totalorder %s13_s14, 4   ;;  %s429_s13 = smov %s431_s15 }
  0xb1   :  { %12 = sbr.rel (!%p10_p5) target bundleno = 2 (0x2), region = 62 }

// kernel: body.7
= control target key start
LH: loop header
LB: loop body
LE: loop exit
PB: predicated region body
PF: predicated region fallthrough
CT: control target
= control target key end

     0   :  { %s555_s15 = smov 0   ;;  %s557_s16 = smov 0   ;;  %s633_s0 = inlined_call_operand.vmem [shape: f32[8,256], index: 0, kind: input, shape index: {}]   ;;  %s634_s1 = inlined_call_operand.vmem [shape: f32[8,8], index: 1, kind: input, shape index: {}]   ;;  %s635_s2 = inlined_call_operand.vmem [shape: f32[8,1], index: 2, kind: input, shape index: {}]   ;;  %s636_s3 = inlined_call_operand.vmem [shape: f32[2,8,8], index: 3, kind: output, shape index: {0}]   ;;  %s637_s4 = inlined_call_operand.vmem [shape: f32[2,8,1], index: 4, kind: output, shape index: {1}]  }
   0x1   :  { %s559_s17 = smov 0  }
   0x2 LB: > { %s27_s18 = sadd.s32 1, %s520_s16  ;;  %p460_p0 = scmp.ge.s32.totalorder %s524_s17, 1  ;;  %s524_s17 = sphi %s559_s17, %s15_s17   ;;  %s520_s16 = sphi %s557_s16, %s639_s16   ;;  %s516_s15 = sphi %s555_s15, %s638_s15  }
   0x3   : > { %p29_p1 = scmp.ge.s32.totalorder %s27_s18, 2  ;;  %p180_p2 = scmp.lt.s32.totalorder %s524_s17, 3 }
   0x5   : > { %s641_s18 = smov (%p29_p1, %s27_s18), 0  ;;  %p181_p3 = pnand %p460_p0, %p180_p2 }
   0x6   : > { %p210_p4 = scmp.lt.s32.totalorder (!%p181_p3), %s516_s15, 1  ;;  %s466_s8 = sshll.u32 (!%p181_p3), %s516_s15, 7 }
   0x7   : > { %184 = sbr.rel (%p181_p3) target bundleno = 452 (0x1c4), region = 32  ;;  %s604_s9 = sadd.s32 (!%p181_p3), 128, %s466_s8 }
   0x8   : > { %p467_p5 = scmp.le.s32.totalorder (!%p181_p3), %s604_s9, 32 }
   0xc   : > { %v526_v0 = vmov 0   ;;  %v233_v1 = vld [vmem:[%s635_s2] sm:$0xff]  ;;  %s211_s21 = scalar_select %p210_p4, %s516_s15, 1  ;;  %vm229_vm0 = vcmask 7168   ;;  %vm227_vm1 = vcmask 64512   ;;  %v527_v4 = vmov 0.0  }
   0xd   : > { %501 = vset.pattern.permute.xlu0 %v526_v0  ;;  %v232_v2 = vld [vmem:[%s634_s1] sm:$0xff]  ;;  %v265_v12 = vlaneseq }
   0xe   : > { %261 = vperm.xlu0 %501, %v233_v1   ;;  %s461_s22 = sshll.u32 %s211_s21, 3 }
   0xf   : > { %s213_s25 = scalar_lea.vmem %s633_s0, %s461_s22  ;;  %s586_s28 = scalar_lea.vmem %s636_s3, %s461_s22  ;;  %v266_v15 = vshrl.u32 %v265_v12, 7 }
  0x10   : > { %s594_s7 = scalar_lea.vmem %s637_s4, %s461_s22  ;;  %v231_v3 = vld [vmem:[%s213_s25] sm:$0xff]  ;;  %228 = vst.msk [vmem:[%s586_s28] sm:$0xff] %vm227_vm1, %v527_v4 }
  0x11   : > { %253 = vmatpush.msra.mxu0 %v231_v3  ;;  %230 = vst.msk [vmem:[%s594_s7] sm:$0xff] %vm229_vm0, %v527_v4 }
  0x12   : > { %464 = vmatmul.msk.f32.vlgmr.msra.gmra.mxu0 %vm227_vm1, %v232_v2 }
  0x80   : > { %v262_v6 = vpop.permute.xlu0 %261 }
  0x8f   : > { %v255_v5 = vpop.f32.mrf.mxu0 }
  0x90   : > { %v258_v7 = vmul.f32 2.0, %v255_v5 }
  0x92   : > { %v264_v8 = vsub.f32 %v262_v6, %v258_v7 }
  0x94   : > { %v267_v9 = vrot.slane %v264_v8, 4 }
  0x96   : > { %v268_v10 = vmin.f32 %v264_v8, %v267_v9 }
  0x98   : > { %v269_v11 = vrot.slane %v268_v10, 2 }
  0x9a   : > { %v270_v13 = vmin.f32 %v268_v10, %v269_v11 }
  0x9c   : > { %v271_v14 = vrot.slane %v270_v13, 1 }
  0x9e   : > { %v272_v16 = vmin.f32 %v270_v13, %v271_v14 }
  0xa0   : > { %vm273_vm2 = vcmp.eq.f32.partialorder %v264_v8, %v272_v16 }
  0xa1   : > { %v274_v17 = vsel %vm273_vm2, %v266_v15, 8 }
  0xa2   : > { %v275_v18 = vrot.slane %v274_v17, 4 }
  0xa4   : > { %vm276_vm3 = vcmp.lt.s32.totalorder %v274_v17, %v275_v18 }
  0xa5   : > { %v277_v19 = vsel %vm276_vm3, %v274_v17, %v275_v18 }
  0xa6   : > { %v278_v20 = vrot.slane %v277_v19, 2 }
  0xa8   : > { %vm279_vm4 = vcmp.lt.s32.totalorder %v277_v19, %v278_v20 }
  0xa9   : > { %v280_v21 = vsel %vm279_vm4, %v277_v19, %v278_v20 }
  0xaa   : > { %v281_v22 = vrot.slane %v280_v21, 1 }
  0xab   : > { %293 = sbr.rel (%p467_p5) target bundleno = 313 (0x139), region = 40 }
  0xac   : > { %vm282_vm5 = vcmp.lt.s32.totalorder %v280_v21, %v281_v22 }
  0xad   : > { %v283_v23 = vsel %vm282_vm5, %v280_v21, %v281_v22 }
  0xae   : > { %vm284_vm6 = vcmp.eq.s32.totalorder %v283_v23, %v266_v15 }
  0xaf   : > { %v465_v24 = vsel %vm284_vm6, 1.0, %v527_v4 }
  0xb0   : > { %318 = vmatpush.xpose.msra.mxu0 %v231_v3  ;;  %v295_v25 = vand.u32 127, %v265_v12  ;;  %v296_v26 = vstv %s466_s8  ;;  %v528_v28 = vmov 0.0   ;;  %v325_v31 = vld [vmem:[%s594_s7] sm:$0xff] }
  0xb1   : > { %v302_v34 = vld [vmem:[%s586_s28] sm:$0xff] }
  0xb2   : > { %v297_v27 = vadd.s32 %v296_v26, %v295_v25 }
  0xb4   : > { %vm298_vm7 = vcmp.lt.s32.totalorder %v297_v27, 32 }
  0xb5   : > { %v468_v29 = vsel %vm298_vm7, 1.0, %v528_v28 }
  0xb6   : > { %v301_v30 = vmul.f32 %v468_v29, %v465_v24 }
  0xb8   : > { %319 = vmatmul.f32.vlgmr.msra.gmra.mxu0 %v301_v30  ;;  %326 = vadd.xlane.f32.xlu0 %v301_v30 }
 0x12b   : > { %v327_v32 = vpop.xlane.xlu0 %326 }
 0x12c   : > { %v328_v33 = vadd.f32 %v327_v32, %v325_v31 }
 0x12e   : > { %330 = vst.msk [vmem:[%s594_s7] sm:$0xff] %vm229_vm0, %v328_v33 }
 0x135   : > { %v320_v35 = vpop.f32.mrf.mxu0 }
 0x136   : > { %v323_v36 = vadd.f32 %v320_v35, %v302_v34 }
 0x138   : > { %324 = vst.msk [vmem:[%s586_s28] sm:$0xff] %vm227_vm1, %v323_v36 }
 0x139 PF: > { %p469_p6 = scmp.gt.s32.totalorder %s604_s9, 32 }
 0x13b   : > { %334 = sbr.rel (%p469_p6) target bundleno = 452 (0x1c4), region = 44 }
 0x140   : > { %351 = vmatpush.xpose.msra.mxu0 %v231_v3  ;;  %359 = vadd.xlane.f32.xlu0 %v465_v24  ;;  %v529_v37 = vmov 1.0   ;;  %v358_v38 = vld [vmem:[%s594_s7] sm:$0xff] }
 0x141   : > { %v335_v41 = vld [vmem:[%s586_s28] sm:$0xff] }
 0x143   : > { %470 = vmatmul.msk.f32.vlgmr.msra.gmra.mxu0 %vm284_vm6, %v529_v37 }
 0x1b3   : > { %v360_v39 = vpop.xlane.xlu0 %359 }
 0x1b4   : > { %v361_v40 = vadd.f32 %v360_v39, %v358_v38 }
 0x1b6   : > { %363 = vst.msk [vmem:[%s594_s7] sm:$0xff] %vm229_vm0, %v361_v40 }
 0x1c0   : > { %v353_v42 = vpop.f32.mrf.mxu0 }
 0x1c1   : > { %v356_v43 = vadd.f32 %v353_v42, %v335_v41 }
 0x1c3   : > { %357 = vst.msk [vmem:[%s586_s28] sm:$0xff] %vm227_vm1, %v356_v43 }
 0x1c4 PF: > { %s15_s17 = sadd.s32 1, %s524_s17   ;;  %s638_s15 = smov %s520_s16 }
 0x1c5   : > { %p12_p7 = scmp.ge.s32.totalorder %s15_s17, 4   ;;  %s639_s16 = smov %s641_s18 }
 0x1c7   :  { %14 = sbr.rel (!%p12_p7) target bundleno = 2 (0x2), region = 86 }

</bundles_post_ra>
